<compile_context>
chip_gen: v5e
topology: v5e:2x2
jax: 0.10.0
libtpu: 0.0.40
codegen_flags: <defaults>
</compile_context>

<pallas_src>
import functools

import jax
import jax.numpy as jnp
from jax.experimental import pallas as pl
from jax.experimental.pallas import tpu as pltpu

EPS = 1e-5


# ---------------------------------------------------------------------------
# Generation-aware sizing
# ---------------------------------------------------------------------------
def _vmem_physical_bytes():
    """Physical VMEM capacity; conservative v7x fallback (64 MiB) if unknown."""
    try:
        info = pltpu.get_tpu_info()
        for attr in ("vmem_capacity_bytes", "vmem_size_bytes", "vmem_bytes"):
            cap = getattr(info, attr, None)
            if cap:
                return int(cap)
    except Exception:
        pass
    return 64 << 20


def _default_caps(physical_vmem):
    """(scoped vmem limit, tn cap, tk cap) per chip generation."""
    vmem_limit = min((physical_vmem * 3) // 4, 96 << 20)  # 96 MiB v5e/v6e, 48 MiB v7x
    big_vmem = physical_vmem >= (100 << 20)
    tn_cap = 1024 if big_vmem else 512
    tk_cap = 512
    return vmem_limit, tn_cap, tk_cap


def _tile_candidates(dim, cap):
    """All multiples of 128 <= cap that evenly divide dim (lane-dense tiles).
    If dim is not a multiple of 128, the only legal tile is the full extent."""
    if dim % 128 != 0:
        return [dim]
    out = [t for t in range(128, min(dim, cap) + 1, 128) if dim % t == 0]
    return out or [dim]


def _plan_layer(B, K, N, out_itemsize, tn_cap, tk_cap, vmem_limit, allow_resident_x):
    """Pick (tn, tk, resident_x) so the double-buffered working set fits VMEM.

    Prefers a VMEM-resident x (no HBM re-reads across N tiles) with the largest
    feature tile; falls back to streamed (B, tk) activation tiles."""
    budget = int(vmem_limit * 0.85)
    tn_opts = sorted(_tile_candidates(N, tn_cap), reverse=True)
    tk_opts = sorted(_tile_candidates(K, tk_cap), reverse=True)

    def usage(tn, tk, resident):
        acc = 4 * B * tn                               # f32 accumulator
        out = 2 * out_itemsize * B * tn                # double-buffered output
        wgt = 2 * 2 * tk * tn                          # double-buffered bf16 weights
        act = 2 * 2 * B * (K if resident else tk)      # bf16 activations (2 bufs, safe)
        return acc + out + wgt + act

    for resident in ((True, False) if allow_resident_x else (False,)):
        for tn in tn_opts:
            for tk in tk_opts:
                if usage(tn, tk, resident) <= budget:
                    return tn, tk, resident
    return tn_opts[-1], tk_opts[-1], False


# ---------------------------------------------------------------------------
# Kernels
# ---------------------------------------------------------------------------
def _x_tile(x_ref, k, tk, resident_x):
    """Current K-tile of the activations, either sliced from the resident x or
    the streamed block provided by the BlockSpec."""
    if not resident_x:
        return x_ref[...]
    start = k * tk
    if tk % 128 == 0:
        start = pl.multiple_of(start, 128)   # aligned lane-axis slice
    return x_ref[:, pl.ds(start, tk)]


def _linear_bn_relu_kernel(x_ref, w_ref, g_ref, be_ref, o_ref, acc_ref, *,
                           tk, resident_x):
    """One (N-tile, K-tile) grid step of relu(batchnorm(x @ w)).

    The pre-BN linear bias is intentionally omitted: training-mode BatchNorm
    subtracts the batch mean, which cancels any per-feature constant exactly."""
    k = pl.program_id(1)

    @pl.when(k == 0)
    def _():
        acc_ref[...] = jnp.zeros_like(acc_ref)

    # bf16 x bf16 -> f32 accumulate on the MXU.
    acc_ref[...] += jnp.dot(_x_tile(x_ref, k, tk, resident_x), w_ref[...],
                            preferred_element_type=jnp.float32)

    @pl.when(k == pl.num_programs(1) - 1)
    def _():
        h = acc_ref[...]                                  # [B, tn] f32, full batch
        mean = jnp.mean(h, axis=0, keepdims=True)
        c = h - mean                                      # two-pass (stable) variance
        var = jnp.mean(c * c, axis=0, keepdims=True)
        scale = g_ref[...] * jax.lax.rsqrt(var + EPS)     # per-column affine fold
        o_ref[...] = jnp.maximum(c * scale + be_ref[...], 0.0).astype(o_ref.dtype)


def _linear_bias_kernel(x_ref, w_ref, b_ref, o_ref, acc_ref, *, tk, resident_x):
    """One (N-tile, K-tile) grid step of x @ w + b (final fc3)."""
    k = pl.program_id(1)

    @pl.when(k == 0)
    def _():
        acc_ref[...] = jnp.zeros_like(acc_ref)

    acc_ref[...] += jnp.dot(_x_tile(x_ref, k, tk, resident_x), w_ref[...],
                            preferred_element_type=jnp.float32)

    @pl.when(k == pl.num_programs(1) - 1)
    def _():
        o_ref[...] = (acc_ref[...] + b_ref[...]).astype(o_ref.dtype)


def _fused_expander_kernel(x_ref, w1_ref, g1_ref, be1_ref,
                           w2_ref, g2_ref, be2_ref,
                           w3_ref, b3_ref, o_ref):
    """Whole expander in one VMEM-resident kernel (small-problem path)."""
    def bn_relu(h, g, be):
        mean = jnp.mean(h, axis=0, keepdims=True)
        c = h - mean
        var = jnp.mean(c * c, axis=0, keepdims=True)
        return jnp.maximum(c * (g * jax.lax.rsqrt(var + EPS)) + be, 0.0)

    h = jnp.dot(x_ref[...], w1_ref[...], preferred_element_type=jnp.float32)
    h = bn_relu(h, g1_ref[...], be1_ref[...]).astype(jnp.bfloat16)
    h = jnp.dot(h, w2_ref[...], preferred_element_type=jnp.float32)
    h = bn_relu(h, g2_ref[...], be2_ref[...]).astype(jnp.bfloat16)
    o_ref[...] = (jnp.dot(h, w3_ref[...], preferred_element_type=jnp.float32)
                  + b3_ref[...]).astype(o_ref.dtype)


# ---------------------------------------------------------------------------
# Wrappers
# ---------------------------------------------------------------------------
def _tiled_layer(kernel, x, w, *cols, out_dtype, tn_cap, tk_cap,
                 vmem_limit, allow_resident_x):
    """One fused layer over a (N//tn, K//tk) grid. Batch stays whole per block."""
    B, K = x.shape
    Kw, N = w.shape
    assert K == Kw, (K, Kw)
    tn, tk, resident = _plan_layer(B, K, N, jnp.dtype(out_dtype).itemsize,
                                   tn_cap, tk_cap, vmem_limit, allow_resident_x)
    grid = (N // tn, K // tk)                         # reduction axis (K) last

    if resident:
        # Constant block index -> DMA'd from HBM exactly once for the whole layer.
        x_spec = pl.BlockSpec((B, K), lambda j, k: (0, 0))
    else:
        x_spec = pl.BlockSpec((B, tk), lambda j, k: (0, k))
    col_specs = [pl.BlockSpec((1, tn), lambda j, k: (0, j)) for _ in cols]

    body = functools.partial(kernel, tk=tk, resident_x=resident)

    return pl.pallas_call(
        body,
        out_shape=jax.ShapeDtypeStruct((B, N), out_dtype),
        grid_spec=pltpu.PrefetchScalarGridSpec(
            num_scalar_prefetch=0,
            grid=grid,
            in_specs=[x_spec,
                      pl.BlockSpec((tk, tn), lambda j, k: (k, j))]   # weights stream
                     + col_specs,                                    # bias / gamma / beta
            out_specs=pl.BlockSpec((B, tn), lambda j, k: (0, j)),
            scratch_shapes=[pltpu.VMEM((B, tn), jnp.float32)],
        ),
        compiler_params=pltpu.CompilerParams(
            dimension_semantics=("parallel", "arbitrary"),
            vmem_limit_bytes=vmem_limit,
        ),
    )(x, w, *cols)


def _fused_fits(xb, params, vmem_limit):
    B, K = xb.shape
    w1, w2, w3 = params["w1t"], params["w2t"], params["w3t"]
    nmax = max(w1.shape[1], w2.shape[1], w3.shape[1])
    bytes_needed = (
        2 * B * K                                   # x (bf16)
        + 2 * (w1.size + w2.size + w3.size)         # weights (bf16)
        + 4 * B * nmax * 3                          # f32 intermediates (generous)
        + 4 * B * w3.shape[1]                       # f32 output
        + 4 * 8 * nmax                              # gamma/beta/bias rows
    )
    return bytes_needed <= int(vmem_limit * 0.7)


def _fused_forward(xb, params, vmem_limit):
    B = xb.shape[0]
    N3 = params["w3t"].shape[1]
    args = (xb, params["w1t"], params["g1"], params["be1"],
            params["w2t"], params["g2"], params["be2"],
            params["w3t"], params["b3"])
    in_specs = [pl.BlockSpec(a.shape, lambda i: (0, 0)) for a in args]
    return pl.pallas_call(
        _fused_expander_kernel,
        out_shape=jax.ShapeDtypeStruct((B, N3), jnp.float32),
        grid_spec=pltpu.PrefetchScalarGridSpec(
            num_scalar_prefetch=0,
            grid=(1,),
            in_specs=in_specs,
            out_specs=pl.BlockSpec((B, N3), lambda i: (0, 0)),
        ),
        compiler_params=pltpu.CompilerParams(
            dimension_semantics=("arbitrary",),
            vmem_limit_bytes=vmem_limit,
        ),
    )(*args)


def expander_forward(x, params, *, tn_cap=None, tk_cap=None,
                     allow_fused=True, allow_resident_x=True):
    """x: [B, input_size] f32.  Weights in params are bf16, pre-transposed [in, out].

    The batch axis is deliberately never tiled so BN batch statistics are exact.
    For best MXU utilization on v6e/v7x, feed B >= 256."""
    physical = _vmem_physical_bytes()
    vmem_limit, tn_def, tk_def = _default_caps(physical)
    tn_cap = tn_def if tn_cap is None else tn_cap
    tk_cap = tk_def if tk_cap is None else tk_cap

    xb = x.astype(jnp.bfloat16)

    if allow_fused and _fused_fits(xb, params, vmem_limit):
        # Small problem: single VMEM-resident kernel, no HBM bounce for h1/h2.
        return _fused_forward(xb, params, vmem_limit)

    h1 = _tiled_layer(_linear_bn_relu_kernel, xb, params["w1t"],
                      params["g1"], params["be1"],
                      out_dtype=jnp.bfloat16, tn_cap=tn_cap, tk_cap=tk_cap,
                      vmem_limit=vmem_limit, allow_resident_x=allow_resident_x)
    h2 = _tiled_layer(_linear_bn_relu_kernel, h1, params["w2t"],
                      params["g2"], params["be2"],
                      out_dtype=jnp.bfloat16, tn_cap=tn_cap, tk_cap=tk_cap,
                      vmem_limit=vmem_limit, allow_resident_x=allow_resident_x)
    return _tiled_layer(_linear_bias_kernel, h2, params["w3t"], params["b3"],
                        out_dtype=jnp.float32, tn_cap=tn_cap, tk_cap=tk_cap,
                        vmem_limit=vmem_limit, allow_resident_x=allow_resident_x)


# ---------------------------------------------------------------------------
# Parameters + pure-JAX reference
# ---------------------------------------------------------------------------
def init_params(key, input_size, output_size):
    """Synthetic parameters matching nn.Linear / nn.BatchNorm1d initialization.
    Weights stored pre-transposed [in, out], bf16 for the MXU. b1/b2 are not
    stored: they are exactly cancelled by training-mode BatchNorm."""
    ks = jax.random.split(key, 6)

    def linear(kw, kb, fan_in, fan_out):
        bound = 1.0 / jnp.sqrt(fan_in)
        w = jax.random.uniform(kw, (fan_out, fan_in), jnp.float32, -bound, bound)
        b = jax.random.uniform(kb, (fan_out,), jnp.float32, -bound, bound)
        return w.T.astype(jnp.bfloat16), b.reshape(1, fan_out)

    w1t, _b1 = linear(ks[0], ks[1], input_size, output_size)    # b1 cancelled by bn1
    w2t, _b2 = linear(ks[2], ks[3], output_size, output_size)   # b2 cancelled by bn2
    w3t, b3 = linear(ks[4], ks[5], output_size, output_size)

    ones = jnp.ones((1, output_size), jnp.float32)
    zeros = jnp.zeros((1, output_size), jnp.float32)
    return {
        "w1t": w1t, "g1": ones, "be1": zeros,
        "w2t": w2t, "g2": ones, "be2": zeros,
        "w3t": w3t, "b3": b3,
    }


def expander_ref(x, params):
    """Pure-JAX mirror of the kernel numerics (bf16 matmuls, f32 BN epilogue)."""
    def bn_relu(h, g, be):
        m = jnp.mean(h, axis=0, keepdims=True)
        c = h - m
        v = jnp.mean(c * c, axis=0, keepdims=True)
        return jnp.maximum(c * (g * jax.lax.rsqrt(v + EPS)) + be, 0.0)

    h = jnp.dot(x.astype(jnp.bfloat16), params["w1t"],
                preferred_element_type=jnp.float32)
    h = bn_relu(h, params["g1"], params["be1"]).astype(jnp.bfloat16)
    h = jnp.dot(h, params["w2t"], preferred_element_type=jnp.float32)
    h = bn_relu(h, params["g2"], params["be2"]).astype(jnp.bfloat16)
    return jnp.dot(h, params["w3t"], preferred_element_type=jnp.float32) + params["b3"]


if __name__ == "__main__":
    key = jax.random.PRNGKey(0)
    k_x, k_p = jax.random.split(key)

    # Small shapes consistent with the module; feature dims are multiples of 128
    # so all output tiles are lane-dense (no masked partial stores).
    B, input_size, output_size = 8, 128, 256
    x = jax.random.normal(k_x, (B, input_size), jnp.float32)
    params = init_params(k_p, input_size, output_size)

    ref = expander_ref(x, params)

    # 1) Auto path: the small problem takes the single fused VMEM-resident kernel.
    out_fused = jax.block_until_ready(expander_forward(x, params))
    # 2) Tiled path with VMEM-resident x (128-wide caps so the (N, K) grid and the
    #    K-accumulation / epilogue gating are actually exercised at this size).
    out_tiled = jax.block_until_ready(
        expander_forward(x, params, allow_fused=False, tn_cap=128, tk_cap=128))
    # 3) Tiled path with streamed x (exercises the streaming activation BlockSpec).
    out_stream = jax.block_until_ready(
        expander_forward(x, params, allow_fused=False, allow_resident_x=False,
                         tn_cap=128, tk_cap=128))

    for out in (out_fused, out_tiled, out_stream):
        assert out.shape == (B, output_size)
        assert jnp.allclose(out, ref, atol=2e-3, rtol=2e-3), \
            float(jnp.max(jnp.abs(out - ref)))

    print("KERNEL_OK")
</pallas_src>

<mosaic_0001>
module attributes {stable_mosaic.version = 11 : i64} {
  func.func @_fused_expander_kernel(%arg0: i32, %arg1: memref<8x128xbf16, #tpu.memory_space<vmem>>, %arg2: memref<128x256xbf16, #tpu.memory_space<vmem>>, %arg3: memref<1x256xf32, #tpu.memory_space<vmem>>, %arg4: memref<1x256xf32, #tpu.memory_space<vmem>>, %arg5: memref<256x256xbf16, #tpu.memory_space<vmem>>, %arg6: memref<1x256xf32, #tpu.memory_space<vmem>>, %arg7: memref<1x256xf32, #tpu.memory_space<vmem>>, %arg8: memref<256x256xbf16, #tpu.memory_space<vmem>>, %arg9: memref<1x256xf32, #tpu.memory_space<vmem>>, %arg10: memref<8x256xf32, #tpu.memory_space<vmem>>) attributes {dimension_semantics = [#tpu.dimension_semantics<arbitrary>], iteration_bounds = array<i64: 1>, scalar_prefetch = 0 : i64, scratch_operands = 0 : i64, tpu.core_type = #tpu.core_type<tc>, window_params = [{pipeline_mode = #tpu.pipeline_mode<synchronous>, transform_indices = @transform_0, window_bounds = array<i64: 8, 128>}, {pipeline_mode = #tpu.pipeline_mode<synchronous>, transform_indices = @transform_1, window_bounds = array<i64: 128, 256>}, {pipeline_mode = #tpu.pipeline_mode<synchronous>, transform_indices = @transform_2, window_bounds = array<i64: 1, 256>}, {pipeline_mode = #tpu.pipeline_mode<synchronous>, transform_indices = @transform_3, window_bounds = array<i64: 1, 256>}, {pipeline_mode = #tpu.pipeline_mode<synchronous>, transform_indices = @transform_4, window_bounds = array<i64: 256, 256>}, {pipeline_mode = #tpu.pipeline_mode<synchronous>, transform_indices = @transform_5, window_bounds = array<i64: 1, 256>}, {pipeline_mode = #tpu.pipeline_mode<synchronous>, transform_indices = @transform_6, window_bounds = array<i64: 1, 256>}, {pipeline_mode = #tpu.pipeline_mode<synchronous>, transform_indices = @transform_7, window_bounds = array<i64: 256, 256>}, {pipeline_mode = #tpu.pipeline_mode<synchronous>, transform_indices = @transform_8, window_bounds = array<i64: 1, 256>}, {pipeline_mode = #tpu.pipeline_mode<synchronous>, transform_indices = @transform_9, window_bounds = array<i64: 8, 256>}]} {
    %c0 = arith.constant 0 : index
    %c0_0 = arith.constant 0 : index
    %0 = vector.load %arg1[%c0, %c0_0] : memref<8x128xbf16, #tpu.memory_space<vmem>>, vector<8x128xbf16>
    %c0_1 = arith.constant 0 : index
    %c0_2 = arith.constant 0 : index
    %1 = vector.load %arg2[%c0_1, %c0_2] : memref<128x256xbf16, #tpu.memory_space<vmem>>, vector<128x256xbf16>
    %cst = arith.constant dense<0.000000e+00> : vector<8x256xf32>
    %2 = tpu.matmul %0, %1, %cst {dimension_numbers = #tpu.dot_dimension_numbers<[1], [0], [0], [1], [0, 0, 1, 1], [], []>} : vector<8x128xbf16>, vector<128x256xbf16>, vector<8x256xf32> -> vector<8x256xf32>
    %c0_3 = arith.constant 0 : index
    %c0_4 = arith.constant 0 : index
    %3 = vector.load %arg3[%c0_3, %c0_4] : memref<1x256xf32, #tpu.memory_space<vmem>>, vector<1x256xf32>
    %c0_5 = arith.constant 0 : index
    %c0_6 = arith.constant 0 : index
    %4 = vector.load %arg4[%c0_5, %c0_6] : memref<1x256xf32, #tpu.memory_space<vmem>>, vector<1x256xf32>
    %cst_7 = arith.constant dense<0.000000e+00> : vector<256xf32>
    %5 = vector.multi_reduction <add>, %2, %cst_7 [0] : vector<8x256xf32> to vector<256xf32>
    %6 = vector.shape_cast %5 : vector<256xf32> to vector<1x256xf32>
    %cst_8 = arith.constant 8.000000e+00 : f32
    %7 = vector.broadcast %cst_8 : f32 to vector<1x256xf32>
    %8 = arith.divf %6, %7 : vector<1x256xf32>
    %9 = vector.broadcast %8 : vector<1x256xf32> to vector<8x256xf32>
    %10 = arith.subf %2, %9 : vector<8x256xf32>
    %11 = arith.mulf %10, %10 : vector<8x256xf32>
    %cst_9 = arith.constant dense<0.000000e+00> : vector<256xf32>
    %12 = vector.multi_reduction <add>, %11, %cst_9 [0] : vector<8x256xf32> to vector<256xf32>
    %13 = vector.shape_cast %12 : vector<256xf32> to vector<1x256xf32>
    %cst_10 = arith.constant 8.000000e+00 : f32
    %14 = vector.broadcast %cst_10 : f32 to vector<1x256xf32>
    %15 = arith.divf %13, %14 : vector<1x256xf32>
    %cst_11 = arith.constant 9.99999974E-6 : f32
    %16 = vector.broadcast %cst_11 : f32 to vector<1x256xf32>
    %17 = arith.addf %15, %16 : vector<1x256xf32>
    %18 = math.rsqrt %17 : vector<1x256xf32>
    %19 = arith.mulf %3, %18 : vector<1x256xf32>
    %20 = vector.broadcast %19 : vector<1x256xf32> to vector<8x256xf32>
    %21 = arith.mulf %10, %20 : vector<8x256xf32>
    %22 = vector.broadcast %4 : vector<1x256xf32> to vector<8x256xf32>
    %23 = arith.addf %21, %22 : vector<8x256xf32>
    %cst_12 = arith.constant 0.000000e+00 : f32
    %24 = vector.broadcast %cst_12 : f32 to vector<8x256xf32>
    %25 = arith.maximumf %23, %24 : vector<8x256xf32>
    %26 = arith.truncf %25 : vector<8x256xf32> to vector<8x256xbf16>
    %c0_13 = arith.constant 0 : index
    %c0_14 = arith.constant 0 : index
    %27 = vector.load %arg5[%c0_13, %c0_14] : memref<256x256xbf16, #tpu.memory_space<vmem>>, vector<256x256xbf16>
    %cst_15 = arith.constant dense<0.000000e+00> : vector<8x256xf32>
    %28 = tpu.matmul %26, %27, %cst_15 {dimension_numbers = #tpu.dot_dimension_numbers<[1], [0], [0], [1], [0, 0, 1, 1], [], []>} : vector<8x256xbf16>, vector<256x256xbf16>, vector<8x256xf32> -> vector<8x256xf32>
    %c0_16 = arith.constant 0 : index
    %c0_17 = arith.constant 0 : index
    %29 = vector.load %arg6[%c0_16, %c0_17] : memref<1x256xf32, #tpu.memory_space<vmem>>, vector<1x256xf32>
    %c0_18 = arith.constant 0 : index
    %c0_19 = arith.constant 0 : index
    %30 = vector.load %arg7[%c0_18, %c0_19] : memref<1x256xf32, #tpu.memory_space<vmem>>, vector<1x256xf32>
    %cst_20 = arith.constant dense<0.000000e+00> : vector<256xf32>
    %31 = vector.multi_reduction <add>, %28, %cst_20 [0] : vector<8x256xf32> to vector<256xf32>
    %32 = vector.shape_cast %31 : vector<256xf32> to vector<1x256xf32>
    %cst_21 = arith.constant 8.000000e+00 : f32
    %33 = vector.broadcast %cst_21 : f32 to vector<1x256xf32>
    %34 = arith.divf %32, %33 : vector<1x256xf32>
    %35 = vector.broadcast %34 : vector<1x256xf32> to vector<8x256xf32>
    %36 = arith.subf %28, %35 : vector<8x256xf32>
    %37 = arith.mulf %36, %36 : vector<8x256xf32>
    %cst_22 = arith.constant dense<0.000000e+00> : vector<256xf32>
    %38 = vector.multi_reduction <add>, %37, %cst_22 [0] : vector<8x256xf32> to vector<256xf32>
    %39 = vector.shape_cast %38 : vector<256xf32> to vector<1x256xf32>
    %cst_23 = arith.constant 8.000000e+00 : f32
    %40 = vector.broadcast %cst_23 : f32 to vector<1x256xf32>
    %41 = arith.divf %39, %40 : vector<1x256xf32>
    %cst_24 = arith.constant 9.99999974E-6 : f32
    %42 = vector.broadcast %cst_24 : f32 to vector<1x256xf32>
    %43 = arith.addf %41, %42 : vector<1x256xf32>
    %44 = math.rsqrt %43 : vector<1x256xf32>
    %45 = arith.mulf %29, %44 : vector<1x256xf32>
    %46 = vector.broadcast %45 : vector<1x256xf32> to vector<8x256xf32>
    %47 = arith.mulf %36, %46 : vector<8x256xf32>
    %48 = vector.broadcast %30 : vector<1x256xf32> to vector<8x256xf32>
    %49 = arith.addf %47, %48 : vector<8x256xf32>
    %cst_25 = arith.constant 0.000000e+00 : f32
    %50 = vector.broadcast %cst_25 : f32 to vector<8x256xf32>
    %51 = arith.maximumf %49, %50 : vector<8x256xf32>
    %52 = arith.truncf %51 : vector<8x256xf32> to vector<8x256xbf16>
    %c0_26 = arith.constant 0 : index
    %c0_27 = arith.constant 0 : index
    %53 = vector.load %arg8[%c0_26, %c0_27] : memref<256x256xbf16, #tpu.memory_space<vmem>>, vector<256x256xbf16>
    %cst_28 = arith.constant dense<0.000000e+00> : vector<8x256xf32>
    %54 = tpu.matmul %52, %53, %cst_28 {dimension_numbers = #tpu.dot_dimension_numbers<[1], [0], [0], [1], [0, 0, 1, 1], [], []>} : vector<8x256xbf16>, vector<256x256xbf16>, vector<8x256xf32> -> vector<8x256xf32>
    %c0_29 = arith.constant 0 : index
    %c0_30 = arith.constant 0 : index
    %55 = vector.load %arg9[%c0_29, %c0_30] : memref<1x256xf32, #tpu.memory_space<vmem>>, vector<1x256xf32>
    %56 = vector.broadcast %55 : vector<1x256xf32> to vector<8x256xf32>
    %57 = arith.addf %54, %56 : vector<8x256xf32>
    %c0_31 = arith.constant 0 : index
    %c0_32 = arith.constant 0 : index
    %58 = vector.load %arg10[%c0_31, %c0_32] : memref<8x256xf32, #tpu.memory_space<vmem>>, vector<8x256xf32>
    tpu.vector_store %arg10[%c0_31, %c0_32], %57 {strides = array<i32>} : memref<8x256xf32, #tpu.memory_space<vmem>>, vector<8x256xf32>,
    return
  }
  func.func @transform_0(%arg0: i32) -> (i32, i32) {
    %c0_i32 = arith.constant 0 : i32
    %c0_i32_0 = arith.constant 0 : i32
    %c0_i32_1 = arith.constant 0 : i32
    return %c0_i32, %c0_i32_0 : i32, i32
  }
  func.func @transform_1(%arg0: i32) -> (i32, i32) {
    %c0_i32 = arith.constant 0 : i32
    %c0_i32_0 = arith.constant 0 : i32
    %c0_i32_1 = arith.constant 0 : i32
    return %c0_i32, %c0_i32_0 : i32, i32
  }
  func.func @transform_2(%arg0: i32) -> (i32, i32) {
    %c0_i32 = arith.constant 0 : i32
    %c0_i32_0 = arith.constant 0 : i32
    %c0_i32_1 = arith.constant 0 : i32
    return %c0_i32, %c0_i32_0 : i32, i32
  }
  func.func @transform_3(%arg0: i32) -> (i32, i32) {
    %c0_i32 = arith.constant 0 : i32
    %c0_i32_0 = arith.constant 0 : i32
    %c0_i32_1 = arith.constant 0 : i32
    return %c0_i32, %c0_i32_0 : i32, i32
  }
  func.func @transform_4(%arg0: i32) -> (i32, i32) {
    %c0_i32 = arith.constant 0 : i32
    %c0_i32_0 = arith.constant 0 : i32
    %c0_i32_1 = arith.constant 0 : i32
    return %c0_i32, %c0_i32_0 : i32, i32
  }
  func.func @transform_5(%arg0: i32) -> (i32, i32) {
    %c0_i32 = arith.constant 0 : i32
    %c0_i32_0 = arith.constant 0 : i32
    %c0_i32_1 = arith.constant 0 : i32
    return %c0_i32, %c0_i32_0 : i32, i32
  }
  func.func @transform_6(%arg0: i32) -> (i32, i32) {
    %c0_i32 = arith.constant 0 : i32
    %c0_i32_0 = arith.constant 0 : i32
    %c0_i32_1 = arith.constant 0 : i32
    return %c0_i32, %c0_i32_0 : i32, i32
  }
  func.func @transform_7(%arg0: i32) -> (i32, i32) {
    %c0_i32 = arith.constant 0 : i32
    %c0_i32_0 = arith.constant 0 : i32
    %c0_i32_1 = arith.constant 0 : i32
    return %c0_i32, %c0_i32_0 : i32, i32
  }
  func.func @transform_8(%arg0: i32) -> (i32, i32) {
    %c0_i32 = arith.constant 0 : i32
    %c0_i32_0 = arith.constant 0 : i32
    %c0_i32_1 = arith.constant 0 : i32
    return %c0_i32, %c0_i32_0 : i32, i32
  }
  func.func @transform_9(%arg0: i32) -> (i32, i32) {
    %c0_i32 = arith.constant 0 : i32
    %c0_i32_0 = arith.constant 0 : i32
    %c0_i32_1 = arith.constant 0 : i32
    return %c0_i32, %c0_i32_0 : i32, i32
  }
}

</mosaic_0001>

<bundles_post_ra>
// kernel: tpu_custom_call.1
= control target key start
LH: loop header
LB: loop body
LE: loop exit
PB: predicated region body
PF: predicated region fallthrough
CT: control target
= control target key end

     0   :  { %14 = vsyncpa [#allocation3], 0  ;;  %s1673_s0 = inlined_call_operand.hbm [shape: bf16[8,128], index: 0, kind: input, shape index: {}]   ;;  %s1674_s1 = inlined_call_operand.hbm [shape: bf16[128,256], index: 1, kind: input, shape index: {}]   ;;  %s1675_s2 = inlined_call_operand.hbm [shape: f32[1,256], index: 2, kind: input, shape index: {}]   ;;  %s1676_s3 = inlined_call_operand.vmem [shape: f32[1,256], index: 3, kind: input, shape index: {}]   ;;  %s1677_s4 = inlined_call_operand.hbm [shape: bf16[256,256], index: 4, kind: input, shape index: {}]   ;;  %s1678_s5 = inlined_call_operand.vmem [shape: f32[1,256], index: 5, kind: input, shape index: {}]   ;;  %s1679_s6 = inlined_call_operand.hbm [shape: f32[1,256], index: 6, kind: input, shape index: {}]   ;;  %s1680_s7 = inlined_call_operand.hbm [shape: bf16[256,256], index: 7, kind: input, shape index: {}]   ;;  %s1681_s8 = inlined_call_operand.vmem [shape: f32[1,256], index: 8, kind: input, shape index: {}]   ;;  %s1682_s9 = inlined_call_operand.hbm [shape: f32[8,256], index: 9, kind: output, shape index: {}]  }
   0x1   :  { %15 = vsyncpa [#allocation6], 0 }
   0x2   :  { %16 = vsyncpa [#allocation9], 0 }
   0x3   :  { %17 = vsyncpa [#allocation12], 0  ;;  %s34_s11 = sshll.u32 %s1674_s1, 4  ;;  %s35_s11 = int_to_ptr.hbm [resolvable:$true] %s34_s11 }
   0x4   :  { %18 = vsyncpa [#allocation4], 0  ;;  %s1526_s12 = smov [#allocation5]   ;;  %s60_s16 = sshll.u32 %s1677_s4, 4  ;;  %s61_s16 = int_to_ptr.hbm [resolvable:$true] %s60_s16 }
   0x5   :  { %s36_s13 = sshll.u32 %s1526_s12, 4  ;;  %s1527_s17 = smov 128   ;;  %s37_s13 = int_to_ptr.vmem [resolvable:$true] %s36_s13 }
   0x6   :  { %s1528_s18 = smov 8   ;;  %s1529_s19 = smov [#allocation8]  }
   0x7   :  { %42 = dma.hbm_to_vmem [thread:$0]  %s35_s11, 2048, %s37_s13, [#allocation6], %s1527_s17, %s1527_s17, %s1528_s18  }
   0x8   :  { %s62_s20 = sshll.u32 %s1529_s19, 4  ;;  %s24_s22 = sshll.u32 %s1673_s0, 4  ;;  %s63_s20 = int_to_ptr.vmem [resolvable:$true] %s62_s20  ;;  %s25_s22 = int_to_ptr.hbm [resolvable:$true] %s24_s22 }
   0x9   :  { %68 = dma.hbm_to_vmem [thread:$0]  %s61_s16, 4096, %s63_s20, [#allocation9], %s1527_s17, %s1527_s17, %s1528_s18  }
   0xa   :  { %s48_s24 = sshll.u32 %s1675_s2, 4  ;;  %s1530_s25 = smov [#allocation2]   ;;  %s49_s24 = int_to_ptr.hbm [resolvable:$true] %s48_s24 }
   0xb   :  { %s26_s26 = sshll.u32 %s1530_s25, 4  ;;  %s1531_s27 = smov [#allocation7]   ;;  %s27_s26 = int_to_ptr.vmem [resolvable:$true] %s26_s26 }
   0xc   :  { %29 = dma.hbm_to_vmem [thread:$0]  %s25_s22, 64, %s27_s26, [#allocation3]  }
   0xd   :  { %s50_s28 = sshll.u32 %s1531_s27, 4  ;;  %s76_s0 = sshll.u32 %s1679_s6, 4  ;;  %s51_s28 = int_to_ptr.vmem [resolvable:$true] %s50_s28  ;;  %s77_s0 = int_to_ptr.hbm [resolvable:$true] %s76_s0 }
   0xe   :  { %53 = dma.hbm_to_vmem [thread:$0]  %s49_s24, 32, %s51_s28, [#allocation6]  }
   0xf   :  { %s86_s12 = sshll.u32 %s1680_s7, 4  ;;  %s1532_s13 = smov [#allocation10]   ;;  %s87_s12 = int_to_ptr.hbm [resolvable:$true] %s86_s12 }
  0x10   :  { %s78_s2 = sshll.u32 %s1532_s13, 4  ;;  %s1533_s14 = smov [#allocation11]   ;;  %s79_s2 = int_to_ptr.vmem [resolvable:$true] %s78_s2 }
  0x11   :  { %81 = dma.hbm_to_vmem [thread:$0]  %s77_s0, 32, %s79_s2, [#allocation9]  }
  0x12   :  { %s88_s15 = sshll.u32 %s1533_s14, 4  ;;  %s89_s15 = int_to_ptr.vmem [resolvable:$true] %s88_s15 }
  0x13   :  { %94 = dma.hbm_to_vmem [thread:$0]  %s87_s12, 4096, %s89_s15, [#allocation12], %s1527_s17, %s1527_s17, %s1528_s18  }
  0x14   :  { %1516 = dma.done.wait [#allocation3], 64  }
  0x15   :  { %1517 = vsyncadd [#allocation3], 4294967232 }
  0x16   :  { %1518 = dma.done.wait [#allocation6], 2080  }
  0x17   :  { %1519 = vsyncadd [#allocation6], 4294965216 }
  0x18   :  { %1520 = dma.done.wait [#allocation9], 4128  }
  0x19   :  { %1521 = vsyncadd [#allocation9], 4294963168 }
  0x1a   :  { %1522 = dma.done.wait [#allocation12], 4096  }
  0x1b   :  { %1523 = vsyncadd [#allocation12], 4294963200  ;;  %v986_v0 = vld [vmem:[#allocation5 + $0x70] sm:$0xf]  ;;  %v1263_v1 = vld [vmem:[#allocation5 + $0x74] sm:$0xf0] }
  0x1c   :  { %v1262_v2 = vld [vmem:[#allocation5 + $0x74] sm:$0xf]  ;;  %v987_v3 = vor.u32 %v1263_v1, %v986_v0  ;;  %v988_v4 = vld [vmem:[#allocation5 + $0x78] sm:$0xf0]  ;;  %v978_v5 = vld [vmem:[#allocation5 + $0x60] sm:$0xf] }
  0x1d   :  { %v1261_v6 = vld [vmem:[#allocation5 + $0x64] sm:$0xf0]  ;;  %v991_v7 = vor.u32 %v1262_v2, %v988_v4  ;;  %v1260_v8 = vld [vmem:[#allocation5 + $0x64] sm:$0xf]  ;;  %v980_v9 = vld [vmem:[#allocation5 + $0x68] sm:$0xf0] }
  0x1e   :  { %218 = vmatpush.bf16.msra.mxu0 %v987_v3  ;;  %v979_v10 = vor.u32 %v1261_v6, %v978_v5  ;;  %v983_v11 = vor.u32 %v1260_v8, %v980_v9  ;;  %v970_v12 = vld [vmem:[#allocation5 + $0x50] sm:$0xf]  ;;  %v1259_v13 = vld [vmem:[#allocation5 + $0x54] sm:$0xf0]  ;;  %v1258_v14 = vld [vmem:[#allocation5 + $0x54] sm:$0xf] }
  0x1f   :  { %231 = vmatpush.bf16.msra.mxu1 %v991_v7  ;;  %v972_v15 = vld [vmem:[#allocation5 + $0x58] sm:$0xf0]  ;;  %v971_v16 = vor.u32 %v1259_v13, %v970_v12  ;;  %v962_v18 = vld [vmem:[#allocation5 + $0x40] sm:$0xf]  ;;  %v1257_v19 = vld [vmem:[#allocation5 + $0x44] sm:$0xf0] }
  0x20   :  { %v975_v17 = vor.u32 %v1258_v14, %v972_v15  ;;  %v1256_v20 = vld [vmem:[#allocation5 + $0x44] sm:$0xf]  ;;  %v964_v21 = vld [vmem:[#allocation5 + $0x48] sm:$0xf0]  ;;  %v963_v22 = vor.u32 %v1257_v19, %v962_v18  ;;  %v954_v24 = vld [vmem:[#allocation5 + $0x30] sm:$0xf] }
  0x21   :  { %v967_v23 = vor.u32 %v1256_v20, %v964_v21  ;;  %v1255_v25 = vld [vmem:[#allocation5 + $0x34] sm:$0xf0]  ;;  %v1254_v26 = vld [vmem:[#allocation5 + $0x34] sm:$0xf]  ;;  %v956_v27 = vld [vmem:[#allocation5 + $0x38] sm:$0xf0] }
  0x22   :  { %219 = vmatpush.bf16.msra.mxu0 %v979_v10  ;;  %v955_v28 = vor.u32 %v1255_v25, %v954_v24  ;;  %v959_v29 = vor.u32 %v1254_v26, %v956_v27  ;;  %v946_v30 = vld [vmem:[#allocation5 + $0x20] sm:$0xf]  ;;  %v1253_v31 = vld [vmem:[#allocation5 + $0x24] sm:$0xf0]  ;;  %v1252_v32 = vld [vmem:[#allocation5 + $0x24] sm:$0xf] }
  0x23   :  { %232 = vmatpush.bf16.msra.mxu1 %v983_v11  ;;  %v948_v33 = vld [vmem:[#allocation5 + $0x28] sm:$0xf0]  ;;  %v947_v34 = vor.u32 %v1253_v31, %v946_v30  ;;  %v938_v36 = vld [vmem:[#allocation5 + $0x10] sm:$0xf]  ;;  %v1251_v37 = vld [vmem:[#allocation5 + $0x14] sm:$0xf0] }
  0x24   :  { %v951_v35 = vor.u32 %v1252_v32, %v948_v33  ;;  %v1250_v38 = vld [vmem:[#allocation5 + $0x14] sm:$0xf]  ;;  %v940_v39 = vld [vmem:[#allocation5 + $0x18] sm:$0xf0]  ;;  %v939_v40 = vor.u32 %v1251_v37, %v938_v36  ;;  %v930_v42 = vld [vmem:[#allocation5] sm:$0xf] }
  0x25   :  { %v943_v41 = vor.u32 %v1250_v38, %v940_v39  ;;  %v1249_v43 = vld [vmem:[#allocation5 + $0x4] sm:$0xf0]  ;;  %v1248_v44 = vld [vmem:[#allocation5 + $0x4] sm:$0xf]  ;;  %v932_v45 = vld [vmem:[#allocation5 + $0x8] sm:$0xf0] }
  0x26   :  { %220 = vmatpush.bf16.msra.mxu0 %v971_v16  ;;  %v931_v46 = vor.u32 %v1249_v43, %v930_v42  ;;  %v935_v47 = vor.u32 %v1248_v44, %v932_v45  ;;  %v121_v48 = vld [vmem:[#allocation2] sm:$0xf]  ;;  %v1534_v49 = vmov 8.0   ;;  %v1050_v59 = vld [vmem:[#allocation8 + $0x70] sm:$0xf]  ;;  %vm310_vm6 = vcmask 1040384  }
  0x27   :  { %233 = vmatpush.bf16.msra.mxu1 %v975_v17  ;;  %1338 = vrcp.f32 %v1534_v49  ;;  %v1279_v60 = vld [vmem:[#allocation8 + $0x74] sm:$0xf0]  ;;  %v1114_v61 = vld [vmem:[#allocation8 + $0xf0] sm:$0xf]  ;;  %v1278_v1 = vld [vmem:[#allocation8 + $0x74] sm:$0xf] }
  0x28   :  { %v1051_v63 = vor.u32 %v1279_v60, %v1050_v59  ;;  %v1295_v0 = vld [vmem:[#allocation8 + $0xf4] sm:$0xf0]  ;;  %v1052_v2 = vld [vmem:[#allocation8 + $0x78] sm:$0xf0]  ;;  %v1294_v6 = vld [vmem:[#allocation8 + $0xf4] sm:$0xf] }
  0x29   :  { %v1115_v4 = vor.u32 %v1295_v0, %v1114_v61  ;;  %v1055_v5 = vor.u32 %v1278_v1, %v1052_v2  ;;  %v1116_v7 = vld [vmem:[#allocation8 + $0xf8] sm:$0xf0]  ;;  %v1042_v12 = vld [vmem:[#allocation8 + $0x60] sm:$0xf]  ;;  %v1277_v13 = vld [vmem:[#allocation8 + $0x64] sm:$0xf0] }
  0x2a   :  { %221 = vmatpush.bf16.msra.mxu0 %v963_v22  ;;  %524 = vmatpush.bf16.msra.mxu2 %v1051_v63  ;;  %v1119_v10 = vor.u32 %v1294_v6, %v1116_v7  ;;  %v1106_v14 = vld [vmem:[#allocation8 + $0xe0] sm:$0xf]  ;;  %v1043_v17 = vor.u32 %v1277_v13, %v1042_v12  ;;  %v1293_v18 = vld [vmem:[#allocation8 + $0xe4] sm:$0xf0]  ;;  %v1276_v19 = vld [vmem:[#allocation8 + $0x64] sm:$0xf] }
  0x2b   :  { %234 = vmatpush.bf16.msra.mxu1 %v967_v23  ;;  %537 = vmatpush.bf16.msra.mxu3 %v1115_v4  ;;  %v1044_v20 = vld [vmem:[#allocation8 + $0x68] sm:$0xf0]  ;;  %v1107_v23 = vor.u32 %v1293_v18, %v1106_v14  ;;  %v1292_v25 = vld [vmem:[#allocation8 + $0xe4] sm:$0xf]  ;;  %v1034_v31 = vld [vmem:[#allocation8 + $0x50] sm:$0xf] }
  0x2c   :  { %v1047_v24 = vor.u32 %v1276_v19, %v1044_v20  ;;  %v1108_v26 = vld [vmem:[#allocation8 + $0xe8] sm:$0xf0]  ;;  %v1275_v32 = vld [vmem:[#allocation8 + $0x54] sm:$0xf0]  ;;  %v1098_v33 = vld [vmem:[#allocation8 + $0xd0] sm:$0xf] }
  0x2d   :  { %v1339_v50 = vpop.eup %1338  ;;  %v1291_v36 = vld [vmem:[#allocation8 + $0xd4] sm:$0xf0]  ;;  %v1274_v37 = vld [vmem:[#allocation8 + $0x54] sm:$0xf]  ;;  %v1036_v38 = vld [vmem:[#allocation8 + $0x58] sm:$0xf0] }
  0x2e   :  { %222 = vmatpush.bf16.msra.mxu0 %v955_v28  ;;  %v259_v51 = vmul.f32 8.0, %v1339_v50  ;;  %vm263_vm0 = vweird.f32 %v1339_v50  ;;  %525 = vmatpush.bf16.msra.mxu2 %v1043_v17  ;;  %v1290_v42 = vld [vmem:[#allocation8 + $0xd4] sm:$0xf]  ;;  %v1100_v43 = vld [vmem:[#allocation8 + $0xd8] sm:$0xf0]  ;;  %s1535_s18 = smov [#allocation13]  }
  0x2f   :  { %235 = vmatpush.bf16.msra.mxu1 %v959_v29  ;;  %v1111_v29 = vor.u32 %v1292_v25, %v1108_v26  ;;  %538 = vmatpush.bf16.msra.mxu3 %v1107_v23  ;;  %v1103_v45 = vor.u32 %v1290_v42, %v1100_v43  ;;  %v1090_v49 = vld [vmem:[#allocation8 + $0xc0] sm:$0xf]  ;;  %v1092_v60 = vld [vmem:[#allocation8 + $0xc8] sm:$0xf0]  ;;  %v1018_v61 = vld [vmem:[#allocation8 + $0x30] sm:$0xf] }
  0x30   :  { %v260_v52 = vsub.f32 1.0, %v259_v51  ;;  %v1082_v0 = vld [vmem:[#allocation8 + $0xb0] sm:$0xf]  ;;  %v1287_v1 = vld [vmem:[#allocation8 + $0xb4] sm:$0xf0]  ;;  %s913_s19 = sshll.u32 %s1535_s18, 4  ;;  %s914_s19 = int_to_ptr.vmem [resolvable:$true] %s913_s19 }
  0x31   :  { %v1083_v4 = vor.u32 %v1287_v1, %v1082_v0  ;;  %v1020_v6 = vld [vmem:[#allocation8 + $0x38] sm:$0xf0]  ;;  %v1010_v13 = vld [vmem:[#allocation8 + $0x20] sm:$0xf]  ;;  %v1269_v14 = vld [vmem:[#allocation8 + $0x24] sm:$0xf0] }
  0x32   :  { %223 = vmatpush.bf16.msra.mxu0 %v947_v34  ;;  %v261_v56 = vmul.f32 %v1339_v50, %v260_v52  ;;  %v1289_v52 = vld [vmem:[#allocation8 + $0xc4] sm:$0xf0]  ;;  %v1011_v17 = vor.u32 %v1269_v14, %v1010_v13  ;;  %v1268_v19 = vld [vmem:[#allocation8 + $0x24] sm:$0xf]  ;;  %v1012_v20 = vld [vmem:[#allocation8 + $0x28] sm:$0xf0] }
  0x33   :  { %236 = vmatpush.bf16.msra.mxu1 %v951_v35  ;;  %v1035_v35 = vor.u32 %v1275_v32, %v1034_v31  ;;  %v1285_v18 = vld [vmem:[#allocation8 + $0xa4] sm:$0xf0]  ;;  %v1015_v23 = vor.u32 %v1268_v19, %v1012_v20  ;;  %v1076_v25 = vld [vmem:[#allocation8 + $0xa8] sm:$0xf0]  ;;  %v1066_v32 = vld [vmem:[#allocation8 + $0x90] sm:$0xf] }
  0x34   :  { %v262_v8 = vadd.f32 %v1339_v50, %v261_v56  ;;  %v1028_v56 = vld [vmem:[#allocation8 + $0x48] sm:$0xf0]  ;;  %v994_v43 = vld [vmem:[#allocation8] sm:$0xf]  ;;  %v244_v14 = vld [vmem:[#allocation7] sm:$0x3] }
  0x35   :  { %526 = vmatpush.bf16.msra.mxu2 %v1035_v35  ;;  %s915_s1 = sshll.u32 %s1682_s9, 4  ;;  %s916_s1 = int_to_ptr.hbm [resolvable:$true] %s915_s1 }
  0x36   :  { %224 = vmatpush.bf16.msra.mxu0 %v939_v40  ;;  %v1622_v27 = vsel %vm263_vm0, %v1339_v50, %v262_v8  ;;  %v1099_v40 = vor.u32 %v1291_v36, %v1098_v33  ;;  %v1283_v33 = vld [vmem:[#allocation8 + $0x94] sm:$0xf0] }
  0x37   :  { %237 = vmatpush.bf16.msra.mxu1 %v943_v41  ;;  %v1039_v41 = vor.u32 %v1274_v37, %v1036_v38  ;;  %v1004_v37 = vld [vmem:[#allocation8 + $0x18] sm:$0xf0]  ;;  %v1282_v38 = vld [vmem:[#allocation8 + $0x94] sm:$0xf] }
  0x38   :  { %539 = vmatpush.bf16.msra.mxu3 %v1099_v40 }
  0x3a   :  { %225 = vmatpush.bf16.msra.mxu0 %v931_v46 }
  0x3b   :  { %238 = vmatpush.bf16.msra.mxu1 %v935_v47  ;;  %v1026_v47 = vld [vmem:[#allocation8 + $0x40] sm:$0xf] }
  0x3d   :  { %226 = vmatmul.bf16.vlgmr.msra.gmra.mxu0 %v121_v48 }
  0x3e   :  { %239 = vmatmul.bf16.vlgmr.msra.gmra.mxu1 %v121_v48  ;;  %550 = vmatpush.bf16.msrb.mxu0 %v1055_v5  ;;  %v1273_v48 = vld [vmem:[#allocation8 + $0x44] sm:$0xf0]  ;;  %v1270_v5 = vld [vmem:[#allocation8 + $0x34] sm:$0xf] }
  0x3f   :  { %563 = vmatpush.bf16.msrb.mxu1 %v1119_v10  ;;  %v1027_v51 = vor.u32 %v1273_v48, %v1026_v47  ;;  %v1023_v8 = vor.u32 %v1270_v5, %v1020_v6  ;;  %v1084_v10 = vld [vmem:[#allocation8 + $0xb8] sm:$0xf0]  ;;  %v1058_v48 = vld [vmem:[#allocation8 + $0x80] sm:$0xf] }
  0x41   :  { %527 = vmatpush.bf16.msra.mxu2 %v1027_v51 }
  0x42   :  { %551 = vmatpush.bf16.msrb.mxu0 %v1047_v24  ;;  %v1284_v24 = vld [vmem:[#allocation8 + $0xa4] sm:$0xf] }
  0x43   :  { %564 = vmatpush.bf16.msrb.mxu1 %v1111_v29  ;;  %v1002_v29 = vld [vmem:[#allocation8 + $0x10] sm:$0xf] }
  0x46   :  { %552 = vmatpush.bf16.msrb.mxu0 %v1039_v41  ;;  %v1067_v41 = vor.u32 %v1283_v33, %v1066_v32 }
  0x47   :  { %565 = vmatpush.bf16.msrb.mxu1 %v1103_v45 }
  0xba   :  { %v1613_v53 = vpop.f32.mrf.mxu0 }
  0xbb   :  { %v246_v54 = vrot.slane %v1613_v53, 4  ;;  %v1616_v55 = vpop.f32.mrf.mxu1 }
  0xbc   :  { %v252_v57 = vrot.slane %v1616_v55, 4 }
  0xbd   :  { %v247_v58 = vadd.f32 %v246_v54, %v1613_v53  ;;  %v1272_v54 = vld [vmem:[#allocation8 + $0x44] sm:$0xf] }
  0xbe   :  { %v253_v62 = vadd.f32 %v252_v57, %v1616_v55  ;;  %v1031_v59 = vor.u32 %v1272_v54, %v1028_v56  ;;  %v996_v54 = vld [vmem:[#allocation8 + $0x8] sm:$0xf0]  ;;  %v1280_v56 = vld [vmem:[#allocation8 + $0x84] sm:$0xf] }
  0xbf   :  { %v248_v3 = vrot.slane %v247_v58, 2 }
  0xc0   :  { %v254_v9 = vrot.slane %v253_v62, 2  ;;  %553 = vmatpush.bf16.msrb.mxu0 %v1031_v59  ;;  %v1060_v59 = vld [vmem:[#allocation8 + $0x88] sm:$0xf0] }
  0xc1   :  { %v249_v11 = vadd.f32 %v248_v3, %v247_v58  ;;  %v1091_v58 = vor.u32 %v1289_v52, %v1090_v49  ;;  %v1281_v49 = vld [vmem:[#allocation8 + $0x84] sm:$0xf0]  ;;  %v1264_v52 = vld [vmem:[#allocation8 + $0x4] sm:$0xf] }
  0xc2   :  { %v255_v15 = vadd.f32 %v254_v9, %v253_v62  ;;  %v229_v16 = vpop.f32.mrf.mxu0  ;;  %v1286_v9 = vld [vmem:[#allocation8 + $0xb4] sm:$0xf] }
  0xc3   :  { %v250_v21 = vrot.slane %v249_v11, 1  ;;  %v242_v22 = vpop.f32.mrf.mxu1  ;;  %540 = vmatpush.bf16.msra.mxu3 %v1091_v58  ;;  %v1087_v12 = vor.u32 %v1286_v9, %v1084_v10 }
  0xc4   :  { %v256_v28 = vrot.slane %v255_v15, 1  ;;  %554 = vmatpush.bf16.msrb.mxu0 %v1023_v8 }
  0xc5   :  { %v251_v30 = vadd.f32 %v250_v21, %v249_v11 }
  0xc6   :  { %v257_v34 = vadd.f32 %v256_v28, %v255_v15  ;;  %v1074_v15 = vld [vmem:[#allocation8 + $0xa0] sm:$0xf]  ;;  %v1079_v28 = vor.u32 %v1284_v24, %v1076_v25 }
  0xc7   :  { %v265_v39 = vmul.f32 %v1622_v27, %v251_v30  ;;  %541 = vmatpush.bf16.msra.mxu3 %v1083_v4  ;;  %v1075_v22 = vor.u32 %v1285_v18, %v1074_v15  ;;  %v1267_v30 = vld [vmem:[#allocation8 + $0x14] sm:$0xf0] }
  0xc8   :  { %v266_v44 = vmul.f32 %v1622_v27, %v257_v34  ;;  %v1266_v34 = vld [vmem:[#allocation8 + $0x14] sm:$0xf]  ;;  %v1003_v36 = vor.u32 %v1267_v30, %v1002_v29  ;;  %555 = vmatpush.bf16.msrb.mxu0 %v1015_v23 }
  0xc9   :  { %v1627_v46 = vsub.f32 %v1613_v53, %v265_v39  ;;  %v1288_v53 = vld [vmem:[#allocation8 + $0xc4] sm:$0xf]  ;;  %v1068_v39 = vld [vmem:[#allocation8 + $0x98] sm:$0xf0]  ;;  %v1007_v42 = vor.u32 %v1266_v34, %v1004_v37 }
  0xca   :  { %v1630_v50 = vsub.f32 %v1616_v55, %v266_v44  ;;  %v1095_v63 = vor.u32 %v1288_v53, %v1092_v60  ;;  %v1271_v55 = vld [vmem:[#allocation8 + $0x34] sm:$0xf0]  ;;  %v1265_v44 = vld [vmem:[#allocation8 + $0x4] sm:$0xf0]  ;;  %v1071_v47 = vor.u32 %v1282_v38, %v1068_v39  ;;  %v1059_v60 = vor.u32 %v1281_v49, %v1058_v48  ;;  %v1242_v48 = vld [vmem:[#allocation11 + $0xf0] sm:$0xf] }
  0xcb   :  { %v269_v57 = vmul.f32 %v1627_v46, %v1627_v46  ;;  %v1019_v3 = vor.u32 %v1271_v55, %v1018_v61  ;;  %542 = vmatpush.bf16.msra.mxu3 %v1075_v22  ;;  %v995_v58 = vor.u32 %v1265_v44, %v994_v43  ;;  %v999_v61 = vor.u32 %v1264_v52, %v996_v54  ;;  %v1178_v43 = vld [vmem:[#allocation11 + $0x70] sm:$0xf]  ;;  %v1311_v44 = vld [vmem:[#allocation11 + $0x74] sm:$0xf0] }
  0xcc   :  { %v270_v62 = vmul.f32 %v1630_v50, %v1630_v50  ;;  %566 = vmatpush.bf16.msrb.mxu1 %v1095_v63  ;;  %556 = vmatpush.bf16.msrb.mxu0 %v1007_v42  ;;  %v1063_v63 = vor.u32 %v1280_v56, %v1060_v59  ;;  %v1327_v49 = vld [vmem:[#allocation11 + $0xf4] sm:$0xf0]  ;;  %v1180_v56 = vld [vmem:[#allocation11 + $0x78] sm:$0xf0] }
  0xcd   :  { %v271_v2 = vrot.slane %v269_v57, 4  ;;  %528 = vmatpush.bf16.msra.mxu2 %v1019_v3  ;;  %v1243_v54 = vor.u32 %v1327_v49, %v1242_v48  ;;  %v1210_v48 = vld [vmem:[#allocation11 + $0xb0] sm:$0xf] }
  0xce   :  { %v277_v7 = vrot.slane %v270_v62, 4 }
  0xcf   :  { %v272_v11 = vadd.f32 %v271_v2, %v269_v57  ;;  %543 = vmatpush.bf16.msra.mxu3 %v1067_v41 }
  0xd0   :  { %v278_v16 = vadd.f32 %v277_v7, %v270_v62  ;;  %567 = vmatpush.bf16.msrb.mxu1 %v1087_v12  ;;  %557 = vmatpush.bf16.msrb.mxu0 %v999_v61 }
  0xd1   :  { %v273_v21 = vrot.slane %v272_v11, 2  ;;  %529 = vmatpush.bf16.msra.mxu2 %v1011_v17  ;;  %v245_v17 = vld [vmem:[%s1676_s3] sm:$0x3] }
  0xd2   :  { %v279_v26 = vrot.slane %v278_v16, 2  ;;  %v323_v23 = vperm.slane %v245_v17, 1 }
  0xd3   :  { %v274_v31 = vadd.f32 %v273_v21, %v272_v11  ;;  %544 = vmatpush.bf16.msra.mxu3 %v1059_v60  ;;  %v322_v21 = vperm.slane %v245_v17, 0 }
  0xd4   :  { %v280_v35 = vadd.f32 %v279_v26, %v278_v16  ;;  %568 = vmatpush.bf16.msrb.mxu1 %v1079_v28 }
  0xd5   :  { %v275_v40 = vrot.slane %v274_v31, 1  ;;  %530 = vmatpush.bf16.msra.mxu2 %v1003_v36 }
  0xd6   :  { %v281_v45 = vrot.slane %v280_v35, 1 }
  0xd7   :  { %v276_v51 = vadd.f32 %v275_v40, %v274_v31  ;;  %867 = vmatpush.bf16.msrb.mxu3 %v1243_v54  ;;  %v1302_v54 = vld [vmem:[#allocation11 + $0x34] sm:$0xf] }
  0xd8   :  { %v282_v57 = vadd.f32 %v281_v45, %v280_v35  ;;  %569 = vmatpush.bf16.msrb.mxu1 %v1071_v47  ;;  %v1179_v47 = vor.u32 %v1311_v44, %v1178_v43 }
  0xd9   :  { %v283_v53 = vmul.f32 %v276_v51, %v1622_v27  ;;  %531 = vmatpush.bf16.msra.mxu2 %v995_v58  ;;  %v1310_v51 = vld [vmem:[#allocation11 + $0x74] sm:$0xf]  ;;  %v1244_v58 = vld [vmem:[#allocation11 + $0xf8] sm:$0xf0] }
  0xda   :  { %v284_v62 = vmul.f32 %v282_v57, %v1622_v27  ;;  %v1326_v57 = vld [vmem:[#allocation11 + $0xf4] sm:$0xf] }
  0xdb   :  { %v285_v55 = vadd.f32 1e-05, %v283_v53  ;;  %v1183_v53 = vor.u32 %v1310_v51, %v1180_v56  ;;  %v1247_v60 = vor.u32 %v1326_v57, %v1244_v58  ;;  %v1148_v56 = vld [vmem:[#allocation11 + $0x38] sm:$0xf0] }
  0xdc   :  { %v286_v0 = vadd.f32 1e-05, %v284_v62  ;;  %570 = vmatpush.bf16.msrb.mxu1 %v1063_v63  ;;  %v1170_v62 = vld [vmem:[#allocation11 + $0x60] sm:$0xf]  ;;  %v1309_v63 = vld [vmem:[#allocation11 + $0x64] sm:$0xf0] }
  0xdd   :  { %1340 = vrsqrt.f32 %v285_v55  ;;  %vm293_vm5 = vweird.f32 %v285_v55  ;;  %854 = vmatpush.bf16.msrb.mxu2 %v1179_v47  ;;  %880 = vmatpush.bf16.msra.mxu0 %v1183_v53  ;;  %v1303_v47 = vld [vmem:[#allocation11 + $0x34] sm:$0xf0]  ;;  %v1212_v53 = vld [vmem:[#allocation11 + $0xb8] sm:$0xf0] }
  0xde   :  { %1342 = vrsqrt.f32 %v286_v0  ;;  %vm303_vm3 = vweird.f32 %v286_v0 }
  0xe0   :  { %893 = vmatpush.bf16.msra.mxu1 %v1247_v60  ;;  %v1138_v60 = vld [vmem:[#allocation11 + $0x20] sm:$0xf] }
  0xe3   :  { %v1341_v1 = vpop.eup %1340 }
  0xe4   :  { %v1343_v2 = vpop.eup %1342  ;;  %v288_v3 = vmul.f32 %v1341_v1, %v285_v55  ;;  %vm294_vm2 = vweird.f32 %v1341_v1 }
  0xe5   :  { %v298_v4 = vmul.f32 %v1343_v2, %v286_v0  ;;  %vm304_vm1 = vweird.f32 %v1343_v2  ;;  %vm295_vm7 = vmor %vm293_vm5, %vm294_vm2 }
  0xe6   :  { %v289_v5 = vmul.f32 %v1341_v1, %v288_v3  ;;  %vm305_vm4 = vmor %vm303_vm3, %vm304_vm1  ;;  %v1234_v3 = vld [vmem:[#allocation11 + $0xe0] sm:$0xf] }
  0xe7   :  { %v299_v6 = vmul.f32 %v1343_v2, %v298_v4  ;;  %v1325_v4 = vld [vmem:[#allocation11 + $0xe4] sm:$0xf0] }
  0xe8   :  { %v290_v7 = vmul.f32 0.5, %v289_v5  ;;  %v1308_v5 = vld [vmem:[#allocation11 + $0x64] sm:$0xf] }
  0xe9   :  { %v300_v8 = vmul.f32 0.5, %v299_v6 }
  0xea   :  { %v291_v9 = vsub.f32 1.5, %v290_v7  ;;  %v1235_v7 = vor.u32 %v1325_v4, %v1234_v3 }
  0xeb   :  { %v301_v10 = vsub.f32 1.5, %v300_v8  ;;  %v1172_v8 = vld [vmem:[#allocation11 + $0x68] sm:$0xf0] }
  0xec   :  { %v292_v11 = vmul.f32 %v1341_v1, %v291_v9  ;;  %v1324_v9 = vld [vmem:[#allocation11 + $0xe4] sm:$0xf]  ;;  %868 = vmatpush.bf16.msrb.mxu3 %v1235_v7  ;;  %v1204_v7 = vld [vmem:[#allocation11 + $0xa8] sm:$0xf0] }
  0xed   :  { %v302_v12 = vmul.f32 %v1343_v2, %v301_v10  ;;  %v1236_v10 = vld [vmem:[#allocation11 + $0xe8] sm:$0xf0] }
  0xee   :  { %v296_v16 = vsel %vm295_vm7, %v1341_v1, %v292_v11 }
  0xef   :  { %v306_v13 = vsel %vm305_vm4, %v1343_v2, %v302_v12  ;;  %v1171_v2 = vor.u32 %v1309_v63, %v1170_v62  ;;  %v1175_v12 = vor.u32 %v1308_v5, %v1172_v8  ;;  %v1301_v63 = vld [vmem:[#allocation11 + $0x24] sm:$0xf0]  ;;  %v1140_v5 = vld [vmem:[#allocation11 + $0x28] sm:$0xf0] }
  0xf0   :  { %v309_v15 = vrot.slane %v306_v13, 7  ;;  %v1239_v13 = vor.u32 %v1324_v9, %v1236_v10  ;;  %v1139_v4 = vor.u32 %v1301_v63, %v1138_v60  ;;  %v1130_v10 = vld [vmem:[#allocation11 + $0x10] sm:$0xf] }
  0xf1   :  { %855 = vmatpush.bf16.msrb.mxu2 %v1171_v2  ;;  %881 = vmatpush.bf16.msra.mxu0 %v1175_v12  ;;  %v1300_v2 = vld [vmem:[#allocation11 + $0x24] sm:$0xf]  ;;  %v1194_v12 = vld [vmem:[#allocation11 + $0x90] sm:$0xf] }
  0xf2   :  { %v311_v18 = vsel %vm310_vm6, %v296_v16, %v309_v15  ;;  %v1162_v15 = vld [vmem:[#allocation11 + $0x50] sm:$0xf]  ;;  %v1307_v16 = vld [vmem:[#allocation11 + $0x54] sm:$0xf0]  ;;  %894 = vmatpush.bf16.msra.mxu1 %v1239_v13 }
  0xf3   :  { %v313_v19 = vmul.f32 %v311_v18, %v244_v14  ;;  %v1163_v18 = vor.u32 %v1307_v16, %v1162_v15  ;;  %v1315_v16 = vld [vmem:[#allocation11 + $0x94] sm:$0xf0] }
  0xf5   :  { %v315_v20 = vperm.slane %v313_v19, 0  ;;  %v316_v22 = vperm.slane %v313_v19, 1  ;;  %v1226_v19 = vld [vmem:[#allocation11 + $0xd0] sm:$0xf]  ;;  %856 = vmatpush.bf16.msrb.mxu2 %v1163_v18  ;;  %v1298_v18 = vld [vmem:[#allocation11 + $0x14] sm:$0xf] }
  0xf7   :  { %v319_v24 = vmul.f32 %v315_v20, %v1627_v46  ;;  %v320_v25 = vmul.f32 %v316_v22, %v1630_v50  ;;  %v1323_v20 = vld [vmem:[#allocation11 + $0xd4] sm:$0xf0] }
  0xf9   :  { %v326_v26 = vadd.f32 %v322_v21, %v319_v24  ;;  %v327_v28 = vadd.f32 %v323_v23, %v320_v25  ;;  %v1306_v21 = vld [vmem:[#allocation11 + $0x54] sm:$0xf]  ;;  %v1227_v23 = vor.u32 %v1323_v20, %v1226_v19  ;;  %v1164_v24 = vld [vmem:[#allocation11 + $0x58] sm:$0xf0] }
  0xfa   :  { %v1322_v25 = vld [vmem:[#allocation11 + $0xd4] sm:$0xf]  ;;  %v1132_v20 = vld [vmem:[#allocation11 + $0x18] sm:$0xf0] }
  0xfb   :  { %v328_v29 = vmax.f32 %v326_v26, 0.0  ;;  %v329_v30 = vmax.f32 %v327_v28, 0.0  ;;  %v1228_v26 = vld [vmem:[#allocation11 + $0xd8] sm:$0xf0]  ;;  %869 = vmatpush.bf16.msrb.mxu3 %v1227_v23 }
  0xfd   :  { %v330_v31 = vpack.c.bf16 %v328_v29, %v328_v29  ;;  %v331_v32 = vpack.c.bf16 %v329_v30, %v329_v30  ;;  %v1167_v29 = vor.u32 %v1306_v21, %v1164_v24  ;;  %v1231_v30 = vor.u32 %v1322_v25, %v1228_v26  ;;  %v1314_v21 = vld [vmem:[#allocation11 + $0x94] sm:$0xf]  ;;  %v1196_v24 = vld [vmem:[#allocation11 + $0x98] sm:$0xf0] }
  0xfe   :  { %v1195_v26 = vor.u32 %v1315_v16, %v1194_v12 }
  0xff   :  { %532 = vmatmul.bf16.vlgmr.msra.gmra.mxu2 %v330_v31  ;;  %545 = vmatmul.bf16.vlgmr.msra.gmra.mxu3 %v331_v32 }
 0x100   :  { %558 = vmatmul.bf16.vlgmr.msrb.gmra.mxu0 %v330_v31  ;;  %571 = vmatmul.bf16.vlgmr.msrb.gmra.mxu1 %v331_v32  ;;  %v1154_v31 = vld [vmem:[#allocation11 + $0x40] sm:$0xf]  ;;  %v1305_v32 = vld [vmem:[#allocation11 + $0x44] sm:$0xf0] }
 0x101   :  { %882 = vmatpush.bf16.msra.mxu0 %v1167_v29  ;;  %895 = vmatpush.bf16.msra.mxu1 %v1231_v30  ;;  %v1297_v29 = vld [vmem:[#allocation11 + $0x4] sm:$0xf0]  ;;  %v1186_v30 = vld [vmem:[#allocation11 + $0x80] sm:$0xf] }
 0x17d   :  { %v559_v33 = vpop.f32.mrf.mxu0  ;;  %v572_v34 = vpop.f32.mrf.mxu1 }
 0x17e   :  { %v573_v35 = vadd.f32 %v572_v34, %v559_v33  ;;  %v1218_v33 = vld [vmem:[#allocation11 + $0xc0] sm:$0xf] }
 0x180   :  { %v584_v36 = vrot.slane %v573_v35, 4 }
 0x182   :  { %v585_v37 = vadd.f32 %v584_v36, %v573_v35  ;;  %v533_v38 = vpop.f32.mrf.mxu2  ;;  %v546_v39 = vpop.f32.mrf.mxu3  ;;  %v1321_v36 = vld [vmem:[#allocation11 + $0xc4] sm:$0xf0] }
 0x183   :  { %v1644_v46 = vadd.f32 %v546_v39, %v533_v38  ;;  %v1156_v38 = vld [vmem:[#allocation11 + $0x48] sm:$0xf0] }
 0x184   :  { %v586_v50 = vrot.slane %v585_v37, 2 }
 0x185   :  { %v578_v40 = vrot.slane %v1644_v46, 4  ;;  %v561_v41 = vpop.f32.mrf.mxu0  ;;  %v574_v42 = vpop.f32.mrf.mxu1 }
 0x186   :  { %v587_v45 = vadd.f32 %v586_v50, %v585_v37  ;;  %v1304_v37 = vld [vmem:[#allocation11 + $0x44] sm:$0xf]  ;;  %v1219_v50 = vor.u32 %v1321_v36, %v1218_v33  ;;  %v1220_v42 = vld [vmem:[#allocation11 + $0xc8] sm:$0xf0]  ;;  %v1199_v33 = vor.u32 %v1314_v21, %v1196_v24 }
 0x187   :  { %v579_v52 = vadd.f32 %v578_v40, %v1644_v46  ;;  %v1159_v40 = vor.u32 %v1304_v37, %v1156_v38  ;;  %v1320_v41 = vld [vmem:[#allocation11 + $0xc4] sm:$0xf]  ;;  %v1124_v36 = vld [vmem:[#allocation11 + $0x8] sm:$0xf0] }
 0x188   :  { %v588_v59 = vrot.slane %v587_v45, 1  ;;  %v1223_v44 = vor.u32 %v1320_v41, %v1220_v42  ;;  %870 = vmatpush.bf16.msrb.mxu3 %v1219_v50  ;;  %v1312_v38 = vld [vmem:[#allocation11 + $0x84] sm:$0xf] }
 0x189   :  { %v580_v61 = vrot.slane %v579_v52, 2  ;;  %883 = vmatpush.bf16.msra.mxu0 %v1159_v40 }
 0x18a   :  { %v589_v55 = vadd.f32 %v588_v59, %v587_v45  ;;  %v535_v0 = vpop.f32.mrf.mxu2  ;;  %v548_v1 = vpop.f32.mrf.mxu3  ;;  %v1146_v45 = vld [vmem:[#allocation11 + $0x30] sm:$0xf]  ;;  %v1318_v59 = vld [vmem:[#allocation11 + $0xb4] sm:$0xf]  ;;  %896 = vmatpush.bf16.msra.mxu1 %v1223_v44 }
 0x18b   :  { %v581_v6 = vadd.f32 %v580_v61, %v579_v52  ;;  %v1147_v51 = vor.u32 %v1303_v47, %v1146_v45  ;;  %v1319_v52 = vld [vmem:[#allocation11 + $0xb4] sm:$0xf0]  ;;  %v1151_v61 = vor.u32 %v1302_v54, %v1148_v56  ;;  %v1215_v62 = vor.u32 %v1318_v59, %v1212_v53  ;;  %v1317_v1 = vld [vmem:[#allocation11 + $0xa4] sm:$0xf0] }
 0x18c   :  { %v591_v11 = vmul.f32 %v589_v55, %v1622_v27  ;;  %v1211_v58 = vor.u32 %v1319_v52, %v1210_v48  ;;  %v1202_v55 = vld [vmem:[#allocation11 + $0xa0] sm:$0xf] }
 0x18d   :  { %v582_v14 = vrot.slane %v581_v6, 1  ;;  %v1203_v9 = vor.u32 %v1317_v1, %v1202_v55  ;;  %884 = vmatpush.bf16.msra.mxu0 %v1151_v61 }
 0x18e   :  { %v1649_v17 = vsub.f32 %v573_v35, %v591_v11  ;;  %v1155_v35 = vor.u32 %v1305_v32, %v1154_v31  ;;  %871 = vmatpush.bf16.msrb.mxu3 %v1211_v58  ;;  %v1299_v11 = vld [vmem:[#allocation11 + $0x14] sm:$0xf0]  ;;  %897 = vmatpush.bf16.msra.mxu1 %v1215_v62  ;;  %v1135_v32 = vor.u32 %v1298_v18, %v1132_v20 }
 0x18f   :  { %v583_v22 = vadd.f32 %v582_v14, %v581_v6  ;;  %v1316_v6 = vld [vmem:[#allocation11 + $0xa4] sm:$0xf]  ;;  %v1143_v14 = vor.u32 %v1300_v2, %v1140_v5  ;;  %v1131_v23 = vor.u32 %v1299_v11, %v1130_v10  ;;  %v576_v62 = vld [vmem:[%s1678_s5] sm:$0x3] }
 0x190   :  { %v595_v28 = vmul.f32 %v1649_v17, %v1649_v17  ;;  %857 = vmatpush.bf16.msrb.mxu2 %v1155_v35  ;;  %v1207_v15 = vor.u32 %v1316_v6, %v1204_v7  ;;  %v1296_v35 = vld [vmem:[#allocation11 + $0x4] sm:$0xf] }
 0x191   :  { %v590_v34 = vmul.f32 %v583_v22, %v1622_v27  ;;  %885 = vmatpush.bf16.msra.mxu0 %v1143_v14  ;;  %v1127_v44 = vor.u32 %v1296_v35, %v1124_v36 }
 0x192   :  { %v602_v39 = vrot.slane %v595_v28, 4  ;;  %872 = vmatpush.bf16.msrb.mxu3 %v1203_v9  ;;  %898 = vmatpush.bf16.msra.mxu1 %v1207_v15  ;;  %v688_v15 = vld [vmem:[%s1681_s8] sm:$0x3] }
 0x193   :  { %v1655_v43 = vsub.f32 %v1644_v46, %v590_v34  ;;  %v1313_v34 = vld [vmem:[#allocation11 + $0x84] sm:$0xf0]  ;;  %v691_v16 = vperm.slane %v688_v15, 1  ;;  %v690_v20 = vperm.slane %v688_v15, 0 }
 0x194   :  { %v603_v49 = vadd.f32 %v602_v39, %v595_v28  ;;  %858 = vmatpush.bf16.msrb.mxu2 %v1147_v51  ;;  %v1122_v28 = vld [vmem:[#allocation11] sm:$0xf]  ;;  %v1188_v39 = vld [vmem:[#allocation11 + $0x88] sm:$0xf0]  ;;  %v1187_v42 = vor.u32 %v1313_v34, %v1186_v30 }
 0x195   :  { %v594_v57 = vmul.f32 %v1655_v43, %v1655_v43  ;;  %v1123_v40 = vor.u32 %v1297_v29, %v1122_v28  ;;  %886 = vmatpush.bf16.msra.mxu0 %v1135_v32  ;;  %v1191_v45 = vor.u32 %v1312_v38, %v1188_v39 }
 0x196   :  { %v604_v46 = vrot.slane %v603_v49, 2  ;;  %873 = vmatpush.bf16.msrb.mxu3 %v1195_v26  ;;  %899 = vmatpush.bf16.msra.mxu1 %v1199_v33 }
 0x197   :  { %v596_v0 = vrot.slane %v594_v57, 4 }
 0x198   :  { %v605_v3 = vadd.f32 %v604_v46, %v603_v49  ;;  %859 = vmatpush.bf16.msrb.mxu2 %v1139_v4 }
 0x199   :  { %v597_v8 = vadd.f32 %v596_v0, %v594_v57  ;;  %887 = vmatpush.bf16.msra.mxu0 %v1127_v44  ;;  %v577_v0 = vld [vmem:[#allocation10] sm:$0x3] }
 0x19a   :  { %v606_v13 = vrot.slane %v605_v3, 1  ;;  %874 = vmatpush.bf16.msrb.mxu3 %v1187_v42  ;;  %900 = vmatpush.bf16.msra.mxu1 %v1191_v45  ;;  %v646_v4 = vperm.slane %v577_v0, 0  ;;  %v647_v6 = vperm.slane %v577_v0, 1 }
 0x19b   :  { %v598_v19 = vrot.slane %v597_v8, 2 }
 0x19c   :  { %v607_v22 = vadd.f32 %v606_v13, %v605_v3  ;;  %860 = vmatpush.bf16.msrb.mxu2 %v1131_v23 }
 0x19d   :  { %v599_v25 = vadd.f32 %v598_v19, %v597_v8 }
 0x19e   :  { %v609_v31 = vmul.f32 %v607_v22, %v1622_v27 }
 0x19f   :  { %v600_v37 = vrot.slane %v599_v25, 1 }
 0x1a0   :  { %v611_v50 = vadd.f32 1e-05, %v609_v31  ;;  %861 = vmatpush.bf16.msrb.mxu2 %v1123_v40 }
 0x1a1   :  { %v601_v41 = vadd.f32 %v600_v37, %v599_v25 }
 0x1a2   :  { %1344 = vrsqrt.f32 %v611_v50  ;;  %vm628_vm9 = vweird.f32 %v611_v50 }
 0x1a3   :  { %v608_v47 = vmul.f32 %v601_v41, %v1622_v27 }
 0x1a5   :  { %v610_v48 = vadd.f32 1e-05, %v608_v47 }
 0x1a7   :  { %1346 = vrsqrt.f32 %v610_v48  ;;  %vm618_vm12 = vweird.f32 %v610_v48 }
 0x1a8   :  { %v1345_v49 = vpop.eup %1344 }
 0x1a9   :  { %v623_v51 = vmul.f32 %v1345_v49, %v611_v50  ;;  %vm629_vm8 = vweird.f32 %v1345_v49 }
 0x1aa   :  { %vm630_vm10 = vmor %vm628_vm9, %vm629_vm8 }
 0x1ab   :  { %v624_v52 = vmul.f32 %v1345_v49, %v623_v51 }
 0x1ad   :  { %v1347_v54 = vpop.eup %1346  ;;  %v625_v56 = vmul.f32 0.5, %v624_v52 }
 0x1ae   :  { %v613_v57 = vmul.f32 %v1347_v54, %v610_v48  ;;  %vm619_vm11 = vweird.f32 %v1347_v54 }
 0x1af   :  { %v626_v58 = vsub.f32 1.5, %v625_v56  ;;  %vm620_vm13 = vmor %vm618_vm12, %vm619_vm11 }
 0x1b0   :  { %v614_v59 = vmul.f32 %v1347_v54, %v613_v57 }
 0x1b1   :  { %v627_v53 = vmul.f32 %v1345_v49, %v626_v58 }
 0x1b2   :  { %v615_v60 = vmul.f32 0.5, %v614_v59 }
 0x1b3   :  { %v631_v46 = vsel %vm630_vm10, %v1345_v49, %v627_v53 }
 0x1b4   :  { %v616_v27 = vsub.f32 1.5, %v615_v60  ;;  %v634_v63 = vrot.slane %v631_v46, 7 }
 0x1b6   :  { %v617_v61 = vmul.f32 %v1347_v54, %v616_v27 }
 0x1b8   :  { %v621_v55 = vsel %vm620_vm13, %v1347_v54, %v617_v61 }
 0x1b9   :  { %v635_v1 = vsel %vm310_vm6, %v621_v55, %v634_v63 }
 0x1ba   :  { %v637_v2 = vmul.f32 %v635_v1, %v576_v62 }
 0x1bc   :  { %v639_v3 = vperm.slane %v637_v2, 0  ;;  %v640_v5 = vperm.slane %v637_v2, 1 }
 0x1be   :  { %v643_v7 = vmul.f32 %v639_v3, %v1655_v43  ;;  %v644_v8 = vmul.f32 %v640_v5, %v1649_v17 }
 0x1c0   :  { %v650_v9 = vadd.f32 %v646_v4, %v643_v7  ;;  %v651_v10 = vadd.f32 %v647_v6, %v644_v8 }
 0x1c2   :  { %v652_v11 = vmax.f32 %v650_v9, 0.0  ;;  %v653_v12 = vmax.f32 %v651_v10, 0.0 }
 0x1c4   :  { %v654_v13 = vpack.c.bf16 %v652_v11, %v652_v11  ;;  %v655_v14 = vpack.c.bf16 %v653_v12, %v653_v12 }
 0x1c6   :  { %862 = vmatmul.bf16.vlgmr.msrb.gmra.mxu2 %v654_v13  ;;  %875 = vmatmul.bf16.vlgmr.msrb.gmra.mxu3 %v655_v14 }
 0x1c7   :  { %888 = vmatmul.bf16.vlgmr.msra.gmra.mxu0 %v654_v13  ;;  %901 = vmatmul.bf16.vlgmr.msra.gmra.mxu1 %v655_v14 }
 0x244   :  { %v889_v18 = vpop.f32.mrf.mxu0  ;;  %v902_v19 = vpop.f32.mrf.mxu1 }
 0x245   :  { %v890_v43 = vadd.f32 %v889_v18, %v691_v16 }
 0x247   :  { %v903_v17 = vadd.f32 %v902_v19, %v890_v43 }
 0x249   :  { %907 = vst [vmem:[#allocation13 + $0x8] sm:$0xff] %v903_v17  ;;  %v863_v21 = vpop.f32.mrf.mxu2  ;;  %v876_v22 = vpop.f32.mrf.mxu3 }
 0x24a   :  { %v864_v23 = vadd.f32 %v863_v21, %v690_v20 }
 0x24c   :  { %v877_v24 = vadd.f32 %v876_v22, %v864_v23  ;;  %v891_v25 = vpop.f32.mrf.mxu0  ;;  %v904_v26 = vpop.f32.mrf.mxu1 }
 0x24e   :  { %906 = vst [vmem:[#allocation13] sm:$0xff] %v877_v24 }
 0x24f   :  { %918 = dma.vmem_to_hbm [thread:$0]  %s914_s19, 256, %s916_s1, [#allocation4]  }
 0x251   :  { %v865_v28 = vpop.f32.mrf.mxu2  ;;  %v878_v29 = vpop.f32.mrf.mxu3 }
 0x252   :  { %1524 = dma.done.wait [#allocation4], 256  }
 0x253   :  { %1525 = vsyncadd [#allocation4], 4294967040 }
 0x254   :  { %923 = vsyncpa [#allocation3], 1 }
 0x255   :  { %924 = vsyncpa [#allocation6], 1 }
 0x256   :  { %925 = vsyncpa [#allocation9], 1 }
 0x257   :  { %926 = vsyncpa [#allocation12], 1 }
 0x258   :  { %927 = vsyncpa [#allocation4], 1 }

</bundles_post_ra>
